<compile_context>
chip_gen: v5e
topology: v5e:2x2
jax: 0.10.0
libtpu: 0.0.40
codegen_flags: <defaults>
</compile_context>

<pallas_src>
import jax
import jax.numpy as jnp
from jax import lax
from jax.experimental import pallas as pl
from jax.experimental.pallas import tpu as pltpu

LANES = 128   # vreg lane width
CHUNK = 32    # rows per inner-loop step (aligned for f32/bf16/int8 tilings)
UNROLL = 2    # inner fori_loop unroll


def _make_kernel(*, tile_rows, tiles_per_core, rows, needs_row_mask):
    n_chunks = tile_rows // CHUNK
    unroll = max(1, min(UNROLL, n_chunks))

    def _red(x):                       # (CHUNK, 128) -> (8, 128), pure vreg adds
        return jnp.sum(x.reshape(CHUNK // 8, 8, LANES), axis=0)

    def kernel(pred_ref, targ_ref, mask_ref, out_ref):
        c = pl.program_id(0)
        t = pl.program_id(1)

        # First tile of this core: zero the resident (1, 6, 8, 128) output block.
        @pl.when(t == 0)
        def _():
            out_ref[...] = jnp.zeros_like(out_ref)

        def make_body(masked, tile_start):
            def body(i, carry):
                a00, a01, a11, b0, b1, sgg = carry
                r0 = pl.multiple_of(i * CHUNK, CHUNK)
                sl = pl.ds(r0, CHUNK)
                p = pred_ref[sl, :].astype(jnp.float32)
                g = targ_ref[sl, :].astype(jnp.float32)
                m = mask_ref[sl, :].astype(jnp.float32)
                if masked:
                    # zero rows past the logical end (garbage from ragged /
                    # phantom blocks); jnp.where so NaN garbage never leaks.
                    rid = (tile_start + r0
                           + lax.broadcasted_iota(jnp.int32, (CHUNK, LANES), 0))
                    ok = rid < rows
                    p = jnp.where(ok, p, 0.0)
                    g = jnp.where(ok, g, 0.0)
                    m = jnp.where(ok, m, 0.0)
                mp = m * p
                mg = m * g
                return (a00 + _red(mp * p), a01 + _red(mp), a11 + _red(m),
                        b0 + _red(mp * g), b1 + _red(mg), sgg + _red(mg * g))
            return body

        def run(masked, tile_start=None):
            init = tuple(jnp.zeros((8, LANES), jnp.float32) for _ in range(6))
            acc = lax.fori_loop(0, n_chunks, make_body(masked, tile_start),
                                init, unroll=unroll)
            for k in range(6):        # six single-vreg RMWs per grid step
                out_ref[0, k] += acc[k]

        if not needs_row_mask:
            run(False)
        else:
            tile_start = (c * tiles_per_core + t) * tile_rows
            # interior tiles keep the zero-overhead path; only boundary /
            # phantom tiles pay for the validity mask.
            @pl.when(tile_start + tile_rows <= rows)
            def _():
                run(False)

            @pl.when(tile_start + tile_rows > rows)
            def _():
                run(True, tile_start)

    return kernel


def scale_and_shift_invariant_loss(prediction, target, mask, *,
                                   tile_rows=2048, num_cores=2):
    """Pallas equivalent of ScaleAndShiftInvariantLoss()(pred, tgt, mask,
    if_pixel_input=True). Returns a float32 scalar."""
    # TODO(synk): the GradientLoss regularization branch (alpha>0, 3D inputs)
    # is unreachable in the reference (it hits `assert False`), so it is not
    # implemented; the debug `print(mask.shape, sum(mask))` is omitted.
    p = jnp.asarray(prediction)
    g = jnp.asarray(target)
    m = jnp.asarray(mask)
    if p.ndim == 2:
        assert p.shape[0] == 1, "only B=1 is faithful to the reference"
    p, g, m = p.reshape(-1), g.reshape(-1), m.reshape(-1)
    if m.dtype == jnp.bool_:
        m = m.astype(jnp.int8)            # i8 streams cleanly; cast is 1B/elem
    n = p.size

    rows = pl.cdiv(n, LANES)
    lane_pad = rows * LANES - n
    if lane_pad:
        # TODO(synk): a sub-128 tail still pads host-side (full-array copy);
        # lane-aligned inputs stream zero-copy in their native dtype.
        p = jnp.pad(p, (0, lane_pad))
        g = jnp.pad(g, (0, lane_pad))
        m = jnp.pad(m, (0, lane_pad))
    p2, g2, m2 = (x.reshape(rows, LANES) for x in (p, g, m))

    # Tile selection: multiple of CHUNK sublanes, no bigger than the input.
    tile_rows = max(CHUNK, (int(tile_rows) // CHUNK) * CHUNK)
    rows_rounded = ((rows + CHUNK - 1) // CHUNK) * CHUNK
    tile_rows = min(tile_rows, rows_rounded)

    num_cores = max(1, int(num_cores))
    total_tiles = pl.cdiv(rows, tile_rows)
    tiles_per_core = pl.cdiv(total_tiles, num_cores)
    has_phantom = num_cores * tiles_per_core > total_tiles
    needs_row_mask = num_cores * tiles_per_core * tile_rows != rows
    max_block = total_tiles - 1

    def in_index(c, t):
        blk = c * tiles_per_core + t
        if has_phantom:                     # clamp fully-OOB phantom blocks;
            blk = jnp.minimum(blk, max_block)   # their rows get masked to 0
        return (blk, 0)

    data_spec = pl.BlockSpec((tile_rows, LANES), in_index)

    in_block_bytes = sum(x.dtype.itemsize for x in (p2, g2, m2)) * tile_rows * LANES
    vmem_limit = int(max(32 << 20, 2 * in_block_bytes + (4 << 20)))

    kernel = _make_kernel(tile_rows=tile_rows, tiles_per_core=tiles_per_core,
                          rows=rows, needs_row_mask=needs_row_mask)

    partials = pl.pallas_call(
        kernel,
        out_shape=jax.ShapeDtypeStruct((num_cores, 6, 8, LANES), jnp.float32),
        grid_spec=pltpu.PrefetchScalarGridSpec(
            num_scalar_prefetch=0,
            grid=(num_cores, tiles_per_core),
            in_specs=[data_spec, data_spec, data_spec],
            out_specs=pl.BlockSpec((1, 6, 8, LANES), lambda c, t: (c, 0, 0, 0)),
        ),
        compiler_params=pltpu.CompilerParams(
            dimension_semantics=("parallel", "arbitrary"),
            vmem_limit_bytes=vmem_limit),
    )(p2, g2, m2)

    # ~10-flop epilogue in plain JAX; per-core partials are merged globally
    # BEFORE the (nonlinear) scale/shift solve.
    mo = jnp.sum(partials, axis=(0, 2, 3))            # (6,) moments
    a00, a01, a11, b0, b1, sgg = (mo[i] for i in range(6))
    det = a00 * a11 - a01 * a01
    ok = det != 0.0
    sdet = jnp.where(ok, det, 1.0)
    scale = jnp.where(ok, (a11 * b0 - a01 * b1) / sdet, 0.0)
    shift = jnp.where(ok, (-a01 * b0 + a00 * b1) / sdet, 0.0)
    # Σ m (scale*p + shift - g)^2 in closed form from the six moments.
    loss = (scale * scale * a00 + 2.0 * scale * shift * a01
            + shift * shift * a11 - 2.0 * scale * b0 - 2.0 * shift * b1 + sgg)
    divisor = 2.0 * a11                                # reduction_batch_based(·, 2M)
    return jnp.where(divisor == 0.0, 0.0,
                     loss / jnp.where(divisor == 0.0, 1.0, divisor))


def ref_loss(prediction, target, mask):
    """Pure-JAX reference mirroring the PyTorch forward (if_pixel_input=True)."""
    p = prediction.astype(jnp.float32)
    g = target.astype(jnp.float32)
    m = mask.astype(jnp.float32)
    a00 = jnp.sum(m * p * p, 1)
    a01 = jnp.sum(m * p, 1)
    a11 = jnp.sum(m, 1)
    b0 = jnp.sum(m * p * g, 1)
    b1 = jnp.sum(m * g, 1)
    det = a00 * a11 - a01 * a01
    valid = det != 0
    sdet = jnp.where(valid, det, 1.0)
    scale = jnp.where(valid, (a11 * b0 - a01 * b1) / sdet, 0.0)
    shift = jnp.where(valid, (-a01 * b0 + a00 * b1) / sdet, 0.0)
    pred_ssi = scale.reshape(1, -1) * p + shift.reshape(1, -1)
    res = pred_ssi - g
    image_loss = jnp.sum(m * res * res, 1)
    divisor = jnp.sum(2.0 * a11)
    return jnp.where(divisor == 0.0, 0.0, jnp.sum(image_loss) / divisor)


if __name__ == "__main__":
    key = jax.random.PRNGKey(0)
    k1, k2, k3 = jax.random.split(key, 3)

    loss_fn = jax.jit(scale_and_shift_invariant_loss,
                      static_argnames=("tile_rows", "num_cores"))

    # (1, N) pixel inputs (if_pixel_input=True path of the reference module)
    B, N = 1, 16384
    pred = jax.random.normal(k1, (B, N), dtype=jnp.float32)
    targ = jax.random.normal(k2, (B, N), dtype=jnp.float32)
    mask = (jax.random.uniform(k3, (B, N)) > 0.3).astype(jnp.float32)
    ref = ref_loss(pred, targ, mask)

    # multi-tile-per-core streaming, fully aligned (fast unmasked path)
    o1 = jax.block_until_ready(loss_fn(pred, targ, mask, tile_rows=32))
    # single real tile: second core gets a phantom (clamped + masked) block
    o2 = jax.block_until_ready(loss_fn(pred, targ, mask))
    assert jnp.allclose(o1, ref, rtol=1e-3, atol=1e-5), (o1, ref)
    assert jnp.allclose(o2, ref, rtol=1e-3, atol=1e-5), (o2, ref)

    # ragged length (not a multiple of 128*tile): in-kernel row masking on core 1
    N2 = 12345
    pred2 = jax.random.normal(k1, (1, N2), dtype=jnp.float32)
    targ2 = jax.random.normal(k2, (1, N2), dtype=jnp.float32)
    mask2 = (jax.random.uniform(k3, (1, N2)) > 0.3).astype(jnp.float32)
    ref2 = ref_loss(pred2, targ2, mask2)
    o3 = jax.block_until_ready(loss_fn(pred2, targ2, mask2, tile_rows=64))
    assert jnp.allclose(o3, ref2, rtol=1e-3, atol=1e-5), (o3, ref2)

    # native low-precision streaming: bf16 prediction/target + int8 mask
    pred_bf = pred.astype(jnp.bfloat16)
    targ_bf = targ.astype(jnp.bfloat16)
    mask_i8 = mask.astype(jnp.int8)
    ref3 = ref_loss(pred_bf.astype(jnp.float32), targ_bf.astype(jnp.float32), mask)
    o4 = jax.block_until_ready(loss_fn(pred_bf, targ_bf, mask_i8, tile_rows=64))
    assert jnp.allclose(o4, ref3, rtol=1e-3, atol=1e-4), (o4, ref3)

    print("KERNEL_OK")
</pallas_src>

<mosaic_0001>
module attributes {stable_mosaic.version = 11 : i64} {
  func.func @kernel(%arg0: i32, %arg1: i32, %arg2: memref<32x128xf32, #tpu.memory_space<vmem>>, %arg3: memref<32x128xf32, #tpu.memory_space<vmem>>, %arg4: memref<32x128xf32, #tpu.memory_space<vmem>>, %arg5: memref<1x6x8x128xf32, #tpu.memory_space<vmem>>) attributes {dimension_semantics = [#tpu.dimension_semantics<parallel>, #tpu.dimension_semantics<arbitrary>], iteration_bounds = array<i64: 2, 2>, scalar_prefetch = 0 : i64, scratch_operands = 0 : i64, tpu.core_type = #tpu.core_type<tc>, window_params = [{transform_indices = @transform_0, window_bounds = array<i64: 32, 128>}, {transform_indices = @transform_1, window_bounds = array<i64: 32, 128>}, {transform_indices = @transform_2, window_bounds = array<i64: 32, 128>}, {transform_indices = @transform_3, window_bounds = array<i64: 1, 6, 8, 128>}]} {
    %c0_i32 = arith.constant 0 : i32
    %0 = arith.cmpi eq, %arg1, %c0_i32 : i32
    %1 = arith.extui %0 : i1 to i32
    %c0_i32_0 = arith.constant 0 : i32
    %2 = arith.cmpi ne, %1, %c0_i32_0 : i32
    scf.if %2 {
      %cst_58 = arith.constant 0.000000e+00 : f32
      %76 = vector.broadcast %cst_58 : f32 to vector<1x6x8x128xf32>
      %c0_59 = arith.constant 0 : index
      %c0_60 = arith.constant 0 : index
      %c0_61 = arith.constant 0 : index
      %c0_62 = arith.constant 0 : index
      %77 = vector.load %arg5[%c0_59, %c0_60, %c0_61, %c0_62] : memref<1x6x8x128xf32, #tpu.memory_space<vmem>>, vector<1x6x8x128xf32>
      tpu.vector_store %arg5[%c0_59, %c0_60, %c0_61, %c0_62], %76 {strides = array<i32>} : memref<1x6x8x128xf32, #tpu.memory_space<vmem>>, vector<1x6x8x128xf32>,
    } else {
    }
    %cst = arith.constant 0.000000e+00 : f32
    %3 = vector.broadcast %cst : f32 to vector<8x128xf32>
    %cst_1 = arith.constant 0.000000e+00 : f32
    %4 = vector.broadcast %cst_1 : f32 to vector<8x128xf32>
    %cst_2 = arith.constant 0.000000e+00 : f32
    %5 = vector.broadcast %cst_2 : f32 to vector<8x128xf32>
    %cst_3 = arith.constant 0.000000e+00 : f32
    %6 = vector.broadcast %cst_3 : f32 to vector<8x128xf32>
    %cst_4 = arith.constant 0.000000e+00 : f32
    %7 = vector.broadcast %cst_4 : f32 to vector<8x128xf32>
    %cst_5 = arith.constant 0.000000e+00 : f32
    %8 = vector.broadcast %cst_5 : f32 to vector<8x128xf32>
    %c0_i32_6 = arith.constant 0 : i32
    %c32_i32 = arith.constant 32 : i32
    %9 = arith.muli %c0_i32_6, %c32_i32 : i32
    %10 = tpu.assume_multiple %9, 32 : i32
    %11 = arith.index_cast %10 : i32 to index
    %c0 = arith.constant 0 : index
    %12 = vector.load %arg2[%11, %c0] : memref<32x128xf32, #tpu.memory_space<vmem>>, vector<32x128xf32>
    %13 = arith.index_cast %10 : i32 to index
    %c0_7 = arith.constant 0 : index
    %14 = vector.load %arg3[%13, %c0_7] : memref<32x128xf32, #tpu.memory_space<vmem>>, vector<32x128xf32>
    %15 = arith.index_cast %10 : i32 to index
    %c0_8 = arith.constant 0 : index
    %16 = vector.load %arg4[%15, %c0_8] : memref<32x128xf32, #tpu.memory_space<vmem>>, vector<32x128xf32>
    %17 = arith.mulf %16, %12 : vector<32x128xf32>
    %18 = arith.mulf %16, %14 : vector<32x128xf32>
    %19 = arith.mulf %17, %12 : vector<32x128xf32>
    %20 = vector.shape_cast %19 : vector<32x128xf32> to vector<4x8x128xf32>
    %cst_9 = arith.constant dense<0.000000e+00> : vector<8x128xf32>
    %21 = vector.multi_reduction <add>, %20, %cst_9 [0] : vector<4x8x128xf32> to vector<8x128xf32>
    %22 = arith.addf %3, %21 : vector<8x128xf32>
    %23 = vector.shape_cast %17 : vector<32x128xf32> to vector<4x8x128xf32>
    %cst_10 = arith.constant dense<0.000000e+00> : vector<8x128xf32>
    %24 = vector.multi_reduction <add>, %23, %cst_10 [0] : vector<4x8x128xf32> to vector<8x128xf32>
    %25 = arith.addf %4, %24 : vector<8x128xf32>
    %26 = vector.shape_cast %16 : vector<32x128xf32> to vector<4x8x128xf32>
    %cst_11 = arith.constant dense<0.000000e+00> : vector<8x128xf32>
    %27 = vector.multi_reduction <add>, %26, %cst_11 [0] : vector<4x8x128xf32> to vector<8x128xf32>
    %28 = arith.addf %5, %27 : vector<8x128xf32>
    %29 = arith.mulf %17, %14 : vector<32x128xf32>
    %30 = vector.shape_cast %29 : vector<32x128xf32> to vector<4x8x128xf32>
    %cst_12 = arith.constant dense<0.000000e+00> : vector<8x128xf32>
    %31 = vector.multi_reduction <add>, %30, %cst_12 [0] : vector<4x8x128xf32> to vector<8x128xf32>
    %32 = arith.addf %6, %31 : vector<8x128xf32>
    %33 = vector.shape_cast %18 : vector<32x128xf32> to vector<4x8x128xf32>
    %cst_13 = arith.constant dense<0.000000e+00> : vector<8x128xf32>
    %34 = vector.multi_reduction <add>, %33, %cst_13 [0] : vector<4x8x128xf32> to vector<8x128xf32>
    %35 = arith.addf %7, %34 : vector<8x128xf32>
    %36 = arith.mulf %18, %14 : vector<32x128xf32>
    %37 = vector.shape_cast %36 : vector<32x128xf32> to vector<4x8x128xf32>
    %cst_14 = arith.constant dense<0.000000e+00> : vector<8x128xf32>
    %38 = vector.multi_reduction <add>, %37, %cst_14 [0] : vector<4x8x128xf32> to vector<8x128xf32>
    %39 = arith.addf %8, %38 : vector<8x128xf32>
    %c1_i32 = arith.constant 1 : i32
    %c0_15 = arith.constant 0 : index
    %c0_16 = arith.constant 0 : index
    %c0_17 = arith.constant 0 : index
    %c0_18 = arith.constant 0 : index
    %40 = vector.load %arg5[%c0_15, %c0_16, %c0_17, %c0_18] : memref<1x6x8x128xf32, #tpu.memory_space<vmem>>, vector<1x1x8x128xf32>
    %41 = vector.shape_cast %40 : vector<1x1x8x128xf32> to vector<8x128xf32>
    %42 = arith.addf %41, %22 : vector<8x128xf32>
    %c0_19 = arith.constant 0 : index
    %c0_20 = arith.constant 0 : index
    %c0_21 = arith.constant 0 : index
    %c0_22 = arith.constant 0 : index
    %43 = vector.load %arg5[%c0_19, %c0_20, %c0_21, %c0_22] : memref<1x6x8x128xf32, #tpu.memory_space<vmem>>, vector<1x1x8x128xf32>
    %44 = vector.shape_cast %43 : vector<1x1x8x128xf32> to vector<8x128xf32>
    %45 = vector.shape_cast %42 : vector<8x128xf32> to vector<1x1x8x128xf32>
    tpu.vector_store %arg5[%c0_19, %c0_20, %c0_21, %c0_22], %45 {strides = array<i32>} : memref<1x6x8x128xf32, #tpu.memory_space<vmem>>, vector<1x1x8x128xf32>,
    %c0_23 = arith.constant 0 : index
    %c1 = arith.constant 1 : index
    %c0_24 = arith.constant 0 : index
    %c0_25 = arith.constant 0 : index
    %46 = vector.load %arg5[%c0_23, %c1, %c0_24, %c0_25] : memref<1x6x8x128xf32, #tpu.memory_space<vmem>>, vector<1x1x8x128xf32>
    %47 = vector.shape_cast %46 : vector<1x1x8x128xf32> to vector<8x128xf32>
    %48 = arith.addf %47, %25 : vector<8x128xf32>
    %c0_26 = arith.constant 0 : index
    %c1_27 = arith.constant 1 : index
    %c0_28 = arith.constant 0 : index
    %c0_29 = arith.constant 0 : index
    %49 = vector.load %arg5[%c0_26, %c1_27, %c0_28, %c0_29] : memref<1x6x8x128xf32, #tpu.memory_space<vmem>>, vector<1x1x8x128xf32>
    %50 = vector.shape_cast %49 : vector<1x1x8x128xf32> to vector<8x128xf32>
    %51 = vector.shape_cast %48 : vector<8x128xf32> to vector<1x1x8x128xf32>
    tpu.vector_store %arg5[%c0_26, %c1_27, %c0_28, %c0_29], %51 {strides = array<i32>} : memref<1x6x8x128xf32, #tpu.memory_space<vmem>>, vector<1x1x8x128xf32>,
    %c0_30 = arith.constant 0 : index
    %c2 = arith.constant 2 : index
    %c0_31 = arith.constant 0 : index
    %c0_32 = arith.constant 0 : index
    %52 = vector.load %arg5[%c0_30, %c2, %c0_31, %c0_32] : memref<1x6x8x128xf32, #tpu.memory_space<vmem>>, vector<1x1x8x128xf32>
    %53 = vector.shape_cast %52 : vector<1x1x8x128xf32> to vector<8x128xf32>
    %54 = arith.addf %53, %28 : vector<8x128xf32>
    %c0_33 = arith.constant 0 : index
    %c2_34 = arith.constant 2 : index
    %c0_35 = arith.constant 0 : index
    %c0_36 = arith.constant 0 : index
    %55 = vector.load %arg5[%c0_33, %c2_34, %c0_35, %c0_36] : memref<1x6x8x128xf32, #tpu.memory_space<vmem>>, vector<1x1x8x128xf32>
    %56 = vector.shape_cast %55 : vector<1x1x8x128xf32> to vector<8x128xf32>
    %57 = vector.shape_cast %54 : vector<8x128xf32> to vector<1x1x8x128xf32>
    tpu.vector_store %arg5[%c0_33, %c2_34, %c0_35, %c0_36], %57 {strides = array<i32>} : memref<1x6x8x128xf32, #tpu.memory_space<vmem>>, vector<1x1x8x128xf32>,
    %c0_37 = arith.constant 0 : index
    %c3 = arith.constant 3 : index
    %c0_38 = arith.constant 0 : index
    %c0_39 = arith.constant 0 : index
    %58 = vector.load %arg5[%c0_37, %c3, %c0_38, %c0_39] : memref<1x6x8x128xf32, #tpu.memory_space<vmem>>, vector<1x1x8x128xf32>
    %59 = vector.shape_cast %58 : vector<1x1x8x128xf32> to vector<8x128xf32>
    %60 = arith.addf %59, %32 : vector<8x128xf32>
    %c0_40 = arith.constant 0 : index
    %c3_41 = arith.constant 3 : index
    %c0_42 = arith.constant 0 : index
    %c0_43 = arith.constant 0 : index
    %61 = vector.load %arg5[%c0_40, %c3_41, %c0_42, %c0_43] : memref<1x6x8x128xf32, #tpu.memory_space<vmem>>, vector<1x1x8x128xf32>
    %62 = vector.shape_cast %61 : vector<1x1x8x128xf32> to vector<8x128xf32>
    %63 = vector.shape_cast %60 : vector<8x128xf32> to vector<1x1x8x128xf32>
    tpu.vector_store %arg5[%c0_40, %c3_41, %c0_42, %c0_43], %63 {strides = array<i32>} : memref<1x6x8x128xf32, #tpu.memory_space<vmem>>, vector<1x1x8x128xf32>,
    %c0_44 = arith.constant 0 : index
    %c4 = arith.constant 4 : index
    %c0_45 = arith.constant 0 : index
    %c0_46 = arith.constant 0 : index
    %64 = vector.load %arg5[%c0_44, %c4, %c0_45, %c0_46] : memref<1x6x8x128xf32, #tpu.memory_space<vmem>>, vector<1x1x8x128xf32>
    %65 = vector.shape_cast %64 : vector<1x1x8x128xf32> to vector<8x128xf32>
    %66 = arith.addf %65, %35 : vector<8x128xf32>
    %c0_47 = arith.constant 0 : index
    %c4_48 = arith.constant 4 : index
    %c0_49 = arith.constant 0 : index
    %c0_50 = arith.constant 0 : index
    %67 = vector.load %arg5[%c0_47, %c4_48, %c0_49, %c0_50] : memref<1x6x8x128xf32, #tpu.memory_space<vmem>>, vector<1x1x8x128xf32>
    %68 = vector.shape_cast %67 : vector<1x1x8x128xf32> to vector<8x128xf32>
    %69 = vector.shape_cast %66 : vector<8x128xf32> to vector<1x1x8x128xf32>
    tpu.vector_store %arg5[%c0_47, %c4_48, %c0_49, %c0_50], %69 {strides = array<i32>} : memref<1x6x8x128xf32, #tpu.memory_space<vmem>>, vector<1x1x8x128xf32>,
    %c0_51 = arith.constant 0 : index
    %c5 = arith.constant 5 : index
    %c0_52 = arith.constant 0 : index
    %c0_53 = arith.constant 0 : index
    %70 = vector.load %arg5[%c0_51, %c5, %c0_52, %c0_53] : memref<1x6x8x128xf32, #tpu.memory_space<vmem>>, vector<1x1x8x128xf32>
    %71 = vector.shape_cast %70 : vector<1x1x8x128xf32> to vector<8x128xf32>
    %72 = arith.addf %71, %39 : vector<8x128xf32>
    %c0_54 = arith.constant 0 : index
    %c5_55 = arith.constant 5 : index
    %c0_56 = arith.constant 0 : index
    %c0_57 = arith.constant 0 : index
    %73 = vector.load %arg5[%c0_54, %c5_55, %c0_56, %c0_57] : memref<1x6x8x128xf32, #tpu.memory_space<vmem>>, vector<1x1x8x128xf32>
    %74 = vector.shape_cast %73 : vector<1x1x8x128xf32> to vector<8x128xf32>
    %75 = vector.shape_cast %72 : vector<8x128xf32> to vector<1x1x8x128xf32>
    tpu.vector_store %arg5[%c0_54, %c5_55, %c0_56, %c0_57], %75 {strides = array<i32>} : memref<1x6x8x128xf32, #tpu.memory_space<vmem>>, vector<1x1x8x128xf32>,
    return
  }
  func.func @transform_0(%arg0: i32, %arg1: i32) -> (i32, i32) {
    %c2_i32 = arith.constant 2 : i32
    %0 = arith.muli %arg0, %c2_i32 : i32
    %1 = arith.addi %0, %arg1 : i32
    %c0_i32 = arith.constant 0 : i32
    %c0_i32_0 = arith.constant 0 : i32
    return %1, %c0_i32 : i32, i32
  }
  func.func @transform_1(%arg0: i32, %arg1: i32) -> (i32, i32) {
    %c2_i32 = arith.constant 2 : i32
    %0 = arith.muli %arg0, %c2_i32 : i32
    %1 = arith.addi %0, %arg1 : i32
    %c0_i32 = arith.constant 0 : i32
    %c0_i32_0 = arith.constant 0 : i32
    return %1, %c0_i32 : i32, i32
  }
  func.func @transform_2(%arg0: i32, %arg1: i32) -> (i32, i32) {
    %c2_i32 = arith.constant 2 : i32
    %0 = arith.muli %arg0, %c2_i32 : i32
    %1 = arith.addi %0, %arg1 : i32
    %c0_i32 = arith.constant 0 : i32
    %c0_i32_0 = arith.constant 0 : i32
    return %1, %c0_i32 : i32, i32
  }
  func.func @transform_3(%arg0: i32, %arg1: i32) -> (i32, i32, i32, i32) {
    %c0_i32 = arith.constant 0 : i32
    %c0_i32_0 = arith.constant 0 : i32
    %c0_i32_1 = arith.constant 0 : i32
    %c0_i32_2 = arith.constant 0 : i32
    return %arg0, %c0_i32, %c0_i32_0, %c0_i32_1 : i32, i32, i32, i32
  }
}

</mosaic_0001>

<bundles_post_ra>
// kernel: scale_and_shift_invariant_loss.1
= control target key start
LH: loop header
LB: loop body
LE: loop exit
PB: predicated region body
PF: predicated region fallthrough
CT: control target
= control target key end

     0   :  { %s1013_s0 = inlined_call_operand.hbm [shape: f32[128,128], index: 0, kind: input, shape index: {}]   ;;  %s1014_s1 = inlined_call_operand.hbm [shape: f32[128,128], index: 1, kind: input, shape index: {}]   ;;  %s1015_s2 = inlined_call_operand.hbm [shape: f32[128,128], index: 2, kind: input, shape index: {}]   ;;  %s1016_s3 = inlined_call_operand.vmem [shape: f32[2,6,8,128], index: 3, kind: output, shape index: {}]  }
   0x1   :  { %1022 = sst [smem:[#allocation13_spill]] %s1014_s1 }
   0x2   :  { %8 = vsyncpa [#allocation3], 0 }
   0x3   :  { %10 = vsyncpa [#allocation3 + $0x1], 0 }
   0x4   :  { %11 = vsyncpa [#allocation5], 0 }
   0x5   :  { %13 = vsyncpa [#allocation5 + $0x1], 0  ;;  %s842_s12 = smov 0   ;;  %s844_s13 = smov 0  }
   0x6   :  { %s846_s14 = smov 0   ;;  %s848_s15 = smov 0  }
   0x7   :  { %s850_s16 = smov 0   ;;  %s852_s17 = smov 0  }
   0x8   :  { %s854_s18 = smov 0   ;;  %s856_s19 = smov 0  }
   0x9 LB: > { %1023 = sst [smem:[#allocation9_spill]] %s809_s17  ;;  %s1017_s20 = sadd.s32 4294967295, %s817_s19   ;;  %s817_s19 = sphi %s856_s19, %s19_s19   ;;  %s813_s18 = sphi %s854_s18, %s1035_s18   ;;  %s809_s17 = sphi %s852_s17, %s1034_s17   ;;  %s805_s16 = sphi %s850_s16, %s1033_s16   ;;  %s801_s15 = sphi %s848_s15, %s1032_s15   ;;  %s797_s14 = sphi %s846_s14, %s1038_s14   ;;  %s793_s13 = sphi %s844_s13, %s1037_s13   ;;  %s789_s12 = sphi %s842_s12, %s1036_s12  }
   0xa   : > { %1024 = sst [smem:[#allocation10_spill]] %s813_s18  ;;  %s28_s21 = sadd.s32 1, %s809_s17 }
   0xb   : > { %p29_p0 = scmp.ge.s32.totalorder %s28_s21, 2  ;;  %s31_s22 = sadd.s32 1, %s813_s18 }
   0xc   : > { %s531_s23 = sshll.u32 %s813_s18, 1  ;;  %s42_s24 = sadd.s32 1, %s797_s14 }
   0xd   : > { %s1040_s21 = smov (%p29_p0, %s28_s21), 0  ;;  %s1042_s22 = smov (!%p29_p0, %s31_s22), %s813_s18 }
   0xe   : > { %1025 = sst [smem:[#allocation11_spill]] %s1040_s21  ;;  %s36_s25 = sadd.s32 %s809_s17, %s531_s23 }
   0xf   : > { %p49_p1 = scmp.ne.s32.totalorder %s797_s14, %s793_s13  ;;  %p33_p2 = scmp.ge.s32.totalorder %s1042_s22, 2 }
  0x10   : > { %p50_p3 = scmp.eq.s32.totalorder %s817_s19, 0  ;;  %p55_p4 = scmp.ne.s32.totalorder %s793_s13, %s789_s12 }
  0x11   : > { %p56_p5 = scmp.eq.s32.totalorder %s1017_s20, 0  ;;  %s1044_s22 = smov (%p33_p2, %s1042_s22), 0 }
  0x12   : > { %1026 = sst [smem:[#allocation12_spill]] %s1044_s22  ;;  %p51_p6 = por %p50_p3, %p49_p1 }
  0x13   : > { %p897_p7 = por %p56_p5, %p55_p4  ;;  %s532_s27 = sshll.u32 %s1044_s22, 1 }
  0x14   : > { %s38_s28 = sadd.s32 %s532_s27, %s1040_s21  ;;  %p589_p8 = scmp.lt.s32.totalorder %s817_s19, 4 }
  0x15   : > { %s39_s29 = ssub.s32 %s36_s25, %s38_s28  ;;  %s165_s30 = sand.u32 1, %s797_s14  }
  0x16   : > { %p40_p9 = scmp.eq.s32.totalorder %s39_s29, 0  ;;  %s905_s4 = sshll.u32 %s165_s30, 5 }
  0x17   : > { %s907_s5 = sshll.u32 %s36_s25, 5  ;;  %p909_p10 = pnand %p589_p8, %p51_p6 }
  0x18   : > { %s914_s7 = scalar_select %p40_p9, %s797_s14, %s42_s24  }
  0x19   : > { %s189_s8 = sand.u32 1, %s817_s19   ;;  %s1029_s1 = sld [smem:[#allocation13_spill]] }
  0x1a   : > { %s193_s12 = scalar_lea.vmem [#allocation4], %s905_s4  ;;  %p551_p11 = scmp.ge.s32.totalorder %s817_s19, 1 }
  0x1b   : > { %s203_s23 = sshll.u32 %s193_s12, 4  ;;  %s190_s25 = scalar_lea.sflag [#allocation5], %s189_s8  ;;  %s204_s23 = int_to_ptr.vmem [resolvable:$true] %s203_s23 }
  0x1c   : > { %s819_s28 = smov 128   ;;  %s820_s29 = smov 8  }
  0x1d   : > { %p235_p12 = scmp.lt.s32.totalorder %s817_s19, 5  ;;  %s169_s12 = scalar_lea.vmem [#allocation2], %s905_s4 }
  0x1e   : > { %s179_s20 = sshll.u32 %s169_s12, 4  ;;  %s166_s8 = scalar_lea.sflag [#allocation3], %s165_s30  ;;  %s180_s20 = int_to_ptr.vmem [resolvable:$true] %s179_s20 }
  0x1f   : > { %s200_s11 = scalar_lea.hbm %s1029_s1, %s907_s5  ;;  %p926_p13 = pnand %p551_p11, %p235_p12 }
  0x20   : > { %s201_s27 = sshll.u32 %s200_s11, 4  ;;  %s176_s11 = scalar_lea.hbm %s1013_s0, %s907_s5  ;;  %s202_s27 = int_to_ptr.hbm [resolvable:$true] %s201_s27 }
  0x21   : > { %585 = dma.hbm_to_vmem [thread:$0]  (!%p909_p10), %s202_s27, 512, %s204_s23, %s190_s25, %s819_s28, %s819_s28, %s820_s29  }
  0x22   : > { %s177_s1 = sshll.u32 %s176_s11, 4  ;;  %s224_s27 = scalar_lea.hbm %s1015_s2, %s907_s5  ;;  %s178_s1 = int_to_ptr.hbm [resolvable:$true] %s177_s1 }
  0x23   : > { %582 = dma.hbm_to_vmem [thread:$0]  (!%p909_p10), %s178_s1, 512, %s180_s20, %s166_s8, %s819_s28, %s819_s28, %s820_s29  }
  0x24   : > { %s217_s21 = scalar_lea.vmem [#allocation6], %s905_s4  ;;  %s225_s17 = sshll.u32 %s224_s27, 4  ;;  %s226_s17 = int_to_ptr.hbm [resolvable:$true] %s225_s17 }
  0x25   : > { %s227_s18 = sshll.u32 %s217_s21, 4  ;;  %239 = sbr.rel (%p926_p13) target bundleno = 83 (0x53), region = 32  ;;  %s228_s18 = int_to_ptr.vmem [resolvable:$true] %s227_s18 }
  0x26   : > { %588 = dma.hbm_to_vmem [thread:$0]  (!%p909_p10), %s226_s17, 512, %s228_s18, %s190_s25, %s819_s28, %s819_s28, %s820_s29  }
  0x27   : > { %s241_s9 = sand.u32 (!%p926_p13), 1, %s793_s13  }
  0x28   : > { %s552_s30 = sshll.u32 (!%p926_p13), %s241_s9, 5  ;;  %s242_s10 = scalar_lea.sflag (!%p926_p13), [#allocation3], %s241_s9 }
  0x29   : > { %s245_s1 = scalar_lea.vmem (!%p926_p13), [#allocation2], %s552_s30 }
  0x2a   : > { %780 = dma.done.wait (%p897_p7), %s242_s10, 512  }
  0x2b   : > { %782 = vsyncadd (%p897_p7), %s242_s10, 4294966784  ;;  %s1031_s20 = sadd.s32 4294967295, %s817_s19   ;;  %s953_s17 = scalar_lea.vmem [#allocation4], %s552_s30 }
  0x2c   : > { %s251_s21 = sand.u32 1, %s1031_s20  }
  0x2d   : > { %s252_s22 = scalar_lea.sflag [#allocation5], %s251_s21 }
  0x2e   : > { %784 = dma.done.wait (%p897_p7), %s252_s22, 1024  }
  0x2f   : > { %786 = vsyncadd (%p897_p7), %s252_s22, 4294966272  ;;  %p308_p0 = scmp.lt.s32.totalorder %s805_s16, 1  ;;  %s265_s25 = scalar_lea.vmem [#allocation6], %s552_s30 }
  0x30   : > { %p556_p1 = scmp.ne.s32.totalorder %s801_s15, 0 }
  0x31   : > { %s1046_s16 = smov (!%p308_p0, %s805_s16), 1 }
  0x32   : > { %s572_s18 = smul.u32 48, %s1046_s16 }
  0x33   : > { %316 = sbr.rel (%p556_p1) target bundleno = 63 (0x3f), region = 48 }
  0x34   : > { %s964_s6 = scalar_lea.vmem %s1016_s3, %s572_s18 }
  0x38   : > { %v821_v0 = vmov 0.0  }
  0x39   : > { %317 = vst [vmem:[%s964_s6] sm:$0xff] %v821_v0 }
  0x3a   : > { %318 = vst [vmem:[%s964_s6 + $0x8] sm:$0xff] %v821_v0 }
  0x3b   : > { %319 = vst [vmem:[%s964_s6 + $0x10] sm:$0xff] %v821_v0 }
  0x3c   : > { %320 = vst [vmem:[%s964_s6 + $0x18] sm:$0xff] %v821_v0 }
  0x3d   : > { %321 = vst [vmem:[%s964_s6 + $0x20] sm:$0xff] %v821_v0 }
  0x3e   : > { %322 = vst [vmem:[%s964_s6 + $0x28] sm:$0xff] %v821_v0 }
  0x3f PF: > { %v323_v1 = vld [vmem:[%s245_s1] sm:$0xff]  ;;  %v324_v2 = vld [vmem:[%s245_s1 + $0x8] sm:$0xff]  ;;  %v325_v3 = vld [vmem:[%s245_s1 + $0x10] sm:$0xff] }
  0x40   : > { %v326_v4 = vld [vmem:[%s245_s1 + $0x18] sm:$0xff]  ;;  %v331_v5 = vld [vmem:[%s265_s25] sm:$0xff]  ;;  %v332_v6 = vld [vmem:[%s265_s25 + $0x8] sm:$0xff] }
  0x41   : > { %v333_v7 = vld [vmem:[%s265_s25 + $0x10] sm:$0xff]  ;;  %v334_v8 = vld [vmem:[%s265_s25 + $0x18] sm:$0xff]  ;;  %v335_v9 = vmul.f32 %v331_v5, %v323_v1  ;;  %v336_v10 = vmul.f32 %v332_v6, %v324_v2  ;;  %v355_v11 = vadd.f32 %v332_v6, %v331_v5  ;;  %v327_v18 = vld [vmem:[%s953_s17] sm:$0xff] }
  0x42   : > { %v337_v12 = vmul.f32 %v333_v7, %v325_v3  ;;  %v338_v13 = vmul.f32 %v334_v8, %v326_v4  ;;  %v328_v19 = vld [vmem:[%s953_s17 + $0x8] sm:$0xff]  ;;  %v559_v22 = vld [vmem:[%s964_s6 + $0x10] sm:$0xff]  ;;  %v330_v29 = vld [vmem:[%s953_s17 + $0x18] sm:$0xff]  ;;  %v339_v34 = vmul.f32 %v331_v5, %v327_v18 }
  0x43   : > { %v343_v14 = vmul.f32 %v335_v9, %v323_v1  ;;  %v344_v15 = vmul.f32 %v336_v10, %v324_v2  ;;  %v351_v16 = vadd.f32 %v336_v10, %v335_v9  ;;  %v356_v17 = vadd.f32 %v355_v11, %v333_v7  ;;  %v329_v23 = vld [vmem:[%s953_s17 + $0x10] sm:$0xff]  ;;  %v557_v31 = vld [vmem:[%s964_s6 + $0x8] sm:$0xff]  ;;  %v379_v40 = vld [vmem:[%s964_s6] sm:$0xff] }
  0x44   : > { %v345_v20 = vmul.f32 %v337_v12, %v325_v3  ;;  %v346_v21 = vmul.f32 %v338_v13, %v326_v4  ;;  %v359_v24 = vmul.f32 %v335_v9, %v327_v18  ;;  %v360_v25 = vmul.f32 %v336_v10, %v328_v19  ;;  %v561_v47 = vld [vmem:[%s964_s6 + $0x18] sm:$0xff]  ;;  %v563_v53 = vld [vmem:[%s964_s6 + $0x20] sm:$0xff] }
  0x45   : > { %v347_v26 = vadd.f32 %v344_v15, %v343_v14  ;;  %v352_v27 = vadd.f32 %v351_v16, %v337_v12  ;;  %v357_v28 = vadd.f32 %v356_v17, %v334_v8  ;;  %v361_v30 = vmul.f32 %v337_v12, %v329_v23  ;;  %v565_v60 = vld [vmem:[%s964_s6 + $0x28] sm:$0xff] }
  0x46   : > { %v362_v32 = vmul.f32 %v338_v13, %v330_v29  ;;  %v363_v33 = vadd.f32 %v360_v25, %v359_v24  ;;  %v340_v35 = vmul.f32 %v332_v6, %v328_v19  ;;  %v341_v39 = vmul.f32 %v333_v7, %v329_v23 }
  0x47   : > { %v348_v36 = vadd.f32 %v347_v26, %v345_v20  ;;  %v353_v37 = vadd.f32 %v352_v27, %v338_v13  ;;  %v388_v38 = vadd.f32 %v559_v22, %v357_v28  ;;  %v342_v42 = vmul.f32 %v334_v8, %v330_v29 }
  0x48   : > { %v364_v41 = vadd.f32 %v363_v33, %v361_v30  ;;  %v367_v43 = vadd.f32 %v340_v35, %v339_v34  ;;  %v371_v44 = vmul.f32 %v339_v34, %v327_v18  ;;  %v372_v48 = vmul.f32 %v340_v35, %v328_v19 }
  0x49   : > { %v349_v45 = vadd.f32 %v348_v36, %v346_v21  ;;  %v384_v46 = vadd.f32 %v557_v31, %v353_v37  ;;  %560 = vst [vmem:[%s964_s6 + $0x10] sm:$0xff] %v388_v38  ;;  %v373_v49 = vmul.f32 %v341_v39, %v329_v23  ;;  %v374_v54 = vmul.f32 %v342_v42, %v330_v29 }
  0x4a   : > { %v365_v50 = vadd.f32 %v364_v41, %v362_v32  ;;  %v368_v51 = vadd.f32 %v367_v43, %v341_v39  ;;  %v375_v55 = vadd.f32 %v372_v48, %v371_v44 }
  0x4b   : > { %v380_v52 = vadd.f32 %v379_v40, %v349_v45  ;;  %558 = vst [vmem:[%s964_s6 + $0x8] sm:$0xff] %v384_v46 }
  0x4c   : > { %v392_v56 = vadd.f32 %v561_v47, %v365_v50  ;;  %v369_v57 = vadd.f32 %v368_v51, %v342_v42  ;;  %v376_v58 = vadd.f32 %v375_v55, %v373_v49 }
  0x4d   : > { %381 = vst [vmem:[%s964_s6] sm:$0xff] %v380_v52 }
  0x4e   : > { %562 = vst [vmem:[%s964_s6 + $0x18] sm:$0xff] %v392_v56  ;;  %v396_v59 = vadd.f32 %v563_v53, %v369_v57  ;;  %v377_v61 = vadd.f32 %v376_v58, %v374_v54 }
  0x50   : > { %564 = vst [vmem:[%s964_s6 + $0x20] sm:$0xff] %v396_v59  ;;  %v400_v62 = vadd.f32 %v565_v60, %v377_v61 }
  0x52   : > { %566 = vst [vmem:[%s964_s6 + $0x28] sm:$0xff] %v400_v62 }
  0x53 PF: > { %s19_s19 = sadd.s32 1, %s817_s19   ;;  %s1032_s15 = sld [smem:[#allocation9_spill]] }
  0x54   : > { %p16_p2 = scmp.ge.s32.totalorder %s19_s19, 6   ;;  %s1033_s16 = sld [smem:[#allocation10_spill]] }
  0x55   : > { %s1034_s17 = sld [smem:[#allocation11_spill]]  ;;  %s1036_s12 = smov %s793_s13 }
  0x56   : > { %s1035_s18 = sld [smem:[#allocation12_spill]]  ;;  %s1037_s13 = smov %s797_s14 }
  0x57   : > { %s1038_s14 = smov %s914_s7  ;;  %18 = sbr.rel (!%p16_p2) target bundleno = 9 (0x9), region = 105 }
  0x5c   :  { %423 = vsyncpa [#allocation3], 1 }
  0x5d   :  { %425 = vsyncpa [#allocation3 + $0x1], 1 }
  0x5e   :  { %426 = vsyncpa [#allocation5], 1 }
  0x5f   :  { %428 = vsyncpa [#allocation5 + $0x1], 1 }

</bundles_post_ra>
